<compile_context>
chip_gen: v7x
topology: tpu7x:2x2x1
jax: 0.10.0
libtpu: 0.0.40
codegen_flags: <defaults>
</compile_context>

<pallas_src>
import jax
import jax.numpy as jnp
from jax import lax
from jax.experimental import pallas as pl
from jax.experimental.pallas import tpu as pltpu


def _gru_encoder_kernel(tok_ref,      # VMEM [seq, 1] int32
                        emb_ref,      # VMEM [V, H] f32
                        wih_ref,      # VMEM [H, 3H] f32 (= w_ih.T, gates r|z|n)
                        whh_ref,      # VMEM [H, 3H] f32 (= w_hh.T, gates r|z|n)
                        bias_ref,     # VMEM [2, 3H]: row0 = folded gi bias,
                                      #              row1 = [0 | 0 | b_hh_n]
                        h0_ref,       # VMEM [1, H]
                        out_ref,      # VMEM [seq, H]
                        hn_ref):      # VMEM [1, H]
    H = h0_ref.shape[1]
    seq = out_ref.shape[0]
    V = emb_ref.shape[0]

    # ---- Embedding gather as a one-hot matmul (single MXU push) ----
    col = lax.broadcasted_iota(jnp.int32, (seq, V), 1)
    tok = jnp.broadcast_to(tok_ref[...], (seq, V))
    onehot = (col == tok).astype(jnp.float32)                     # (seq, V)
    x_seq = jnp.dot(onehot, emb_ref[...],
                    preferred_element_type=jnp.float32)           # (seq, H)

    # ---- Fused, hoisted input projection: one (seq,H)x(H,3H) matmul ----
    gi = jnp.dot(x_seq, wih_ref[...],
                 preferred_element_type=jnp.float32) + bias_ref[0:1, :]  # (seq, 3H)

    whh = whh_ref[...]                                             # (H, 3H)
    b_hh_pad = bias_ref[1:2, :]                                    # (1, 3H), n lanes only

    # ---- Recurrent loop: fully unrolled; one MXU push + one sigmoid/step ----
    h = h0_ref[...]                                                # (1, H)
    for t in range(seq):
        gh = jnp.dot(h, whh, preferred_element_type=jnp.float32) + b_hh_pad  # (1, 3H)
        rz = jax.nn.sigmoid(gi[t:t + 1, 0:2 * H] + gh[:, 0:2 * H])           # fused r|z
        r = rz[:, 0:H]
        z = rz[:, H:2 * H]
        n = jnp.tanh(gi[t:t + 1, 2 * H:3 * H] + r * gh[:, 2 * H:3 * H])
        h = n + z * (h - n)                                        # == (1-z)*n + z*h
        out_ref[t:t + 1, :] = h                                    # store off the dep chain
    hn_ref[...] = h


def encoder_forward(word_inputs, hidden, emb, w_ih, w_hh, b_ih, b_hh):
    """Mirrors Encoder.forward(word_inputs, hidden) for the GRU config."""
    seq = word_inputs.shape[0]
    vocab, H = emb.shape
    h0 = hidden.reshape(1, H).astype(jnp.float32)

    w_ih = w_ih.astype(jnp.float32)                    # (3H, H), PyTorch gate order r,z,n
    w_hh = w_hh.astype(jnp.float32)
    b_ih = b_ih.astype(jnp.float32)
    b_hh = b_hh.astype(jnp.float32)

    # Fused transposed weights: x @ w.T gives lanes [r | z | n].
    wih_all = w_ih.T                                   # (H, 3H)
    whh_all = w_hh.T                                   # (H, 3H)

    zeros_h = jnp.zeros((H,), jnp.float32)
    bias = jnp.stack([
        b_ih + jnp.concatenate([b_hh[0:2 * H], zeros_h]),          # r/z biases folded, n keeps b_ih_n
        jnp.concatenate([zeros_h, zeros_h, b_hh[2 * H:3 * H]]),    # b_hh_n (inside r * (...))
    ])                                                             # (2, 3H)

    # Clamp token ids (out-of-range ids would otherwise yield all-zero one-hots).
    tok = jnp.clip(word_inputs.astype(jnp.int32), 0, vocab - 1).reshape(seq, 1)

    out, hn = pl.pallas_call(
        _gru_encoder_kernel,
        out_shape=(jax.ShapeDtypeStruct((seq, H), jnp.float32),
                   jax.ShapeDtypeStruct((1, H), jnp.float32)),
        grid_spec=pltpu.PrefetchScalarGridSpec(
            num_scalar_prefetch=0,
            grid=(1,),
            in_specs=[
                pl.BlockSpec((seq, 1), lambda i: (0, 0)),
                pl.BlockSpec((vocab, H), lambda i: (0, 0)),
                pl.BlockSpec((H, 3 * H), lambda i: (0, 0)),
                pl.BlockSpec((H, 3 * H), lambda i: (0, 0)),
                pl.BlockSpec((2, 3 * H), lambda i: (0, 0)),
                pl.BlockSpec((1, H), lambda i: (0, 0)),
            ],
            out_specs=[
                pl.BlockSpec((seq, H), lambda i: (0, 0)),
                pl.BlockSpec((1, H), lambda i: (0, 0)),
            ],
        ),
        compiler_params=pltpu.CompilerParams(dimension_semantics=("arbitrary",)),
    )(tok, emb.astype(jnp.float32), wih_all, whh_all, bias, h0)

    # Match PyTorch shapes: output (seq, 1, hidden), hidden (n_layers, 1, hidden).
    return out.reshape(seq, 1, H), hn.reshape(1, 1, H)


def _gru_reference(word_inputs, hidden, emb, w_ih, w_hh, b_ih, b_hh):
    """Pure-JAX reference matching torch.nn.GRU(num_layers=1, unidirectional)."""
    H = emb.shape[1]
    x_seq = emb[word_inputs]                 # (seq, H)
    h0 = hidden.reshape(H)

    def cell(h, x):
        gi = x @ w_ih.T + b_ih
        gh = h @ w_hh.T + b_hh
        r = jax.nn.sigmoid(gi[:H] + gh[:H])
        z = jax.nn.sigmoid(gi[H:2 * H] + gh[H:2 * H])
        n = jnp.tanh(gi[2 * H:] + r * gh[2 * H:])
        h_new = (1.0 - z) * n + z * h
        return h_new, h_new

    hT, ys = lax.scan(cell, h0, x_seq)
    return ys.reshape(-1, 1, H), hT.reshape(1, 1, H)


if __name__ == "__main__":
    VOCAB = 64        # Encoder input_size
    HIDDEN = 32       # config.hidden_size
    SEQ = 8           # len(word_inputs)
    N_LAYERS = 1      # config.n_layers
    BIDIR = 0         # config.bidirectional = False

    key = jax.random.PRNGKey(0)
    k_tok, k_emb, k_wih, k_whh, k_bih, k_bhh = jax.random.split(key, 6)

    # Deterministic parameter init (PyTorch-like: Embedding ~ N(0,1),
    # GRU params ~ U(-1/sqrt(H), 1/sqrt(H))).
    scale = 1.0 / jnp.sqrt(HIDDEN)
    emb = jax.random.normal(k_emb, (VOCAB, HIDDEN), dtype=jnp.float32)
    w_ih = jax.random.uniform(k_wih, (3 * HIDDEN, HIDDEN), jnp.float32, -scale, scale)
    w_hh = jax.random.uniform(k_whh, (3 * HIDDEN, HIDDEN), jnp.float32, -scale, scale)
    b_ih = jax.random.uniform(k_bih, (3 * HIDDEN,), jnp.float32, -scale, scale)
    b_hh = jax.random.uniform(k_bhh, (3 * HIDDEN,), jnp.float32, -scale, scale)

    # Example inputs: token sequence + init_hidden() (zeros).
    word_inputs = jax.random.randint(k_tok, (SEQ,), 0, VOCAB, dtype=jnp.int32)
    hidden0 = jnp.zeros((N_LAYERS * (1 + BIDIR), 1, HIDDEN), dtype=jnp.float32)

    output, hidden = encoder_forward(word_inputs, hidden0, emb, w_ih, w_hh, b_ih, b_hh)
    output = jax.block_until_ready(output)
    hidden = jax.block_until_ready(hidden)

    out_ref, hid_ref = _gru_reference(word_inputs, hidden0, emb, w_ih, w_hh, b_ih, b_hh)

    assert output.shape == (SEQ, 1, HIDDEN) and hidden.shape == (1, 1, HIDDEN)
    assert jnp.allclose(output, out_ref, atol=1e-5, rtol=1e-5)
    assert jnp.allclose(hidden, hid_ref, atol=1e-5, rtol=1e-5)
    print("KERNEL_OK")
</pallas_src>

<mosaic_0001>
module attributes {stable_mosaic.version = 11 : i64} {
  func.func @_gru_encoder_kernel(%arg0: i32, %arg1: memref<8x1xi32, #tpu.memory_space<vmem>>, %arg2: memref<64x32xf32, #tpu.memory_space<vmem>>, %arg3: memref<32x96xf32, #tpu.memory_space<vmem>>, %arg4: memref<32x96xf32, #tpu.memory_space<vmem>>, %arg5: memref<2x96xf32, #tpu.memory_space<vmem>>, %arg6: memref<1x32xf32, #tpu.memory_space<vmem>>, %arg7: memref<8x32xf32, #tpu.memory_space<vmem>>, %arg8: memref<1x32xf32, #tpu.memory_space<vmem>>) attributes {dimension_semantics = [#tpu.dimension_semantics<arbitrary>], iteration_bounds = array<i64: 1>, scalar_prefetch = 0 : i64, scratch_operands = 0 : i64, tpu.core_type = #tpu.core_type<tc>, window_params = [{pipeline_mode = #tpu.pipeline_mode<synchronous>, transform_indices = @transform_0, window_bounds = array<i64: 8, 1>}, {pipeline_mode = #tpu.pipeline_mode<synchronous>, transform_indices = @transform_1, window_bounds = array<i64: 64, 32>}, {pipeline_mode = #tpu.pipeline_mode<synchronous>, transform_indices = @transform_2, window_bounds = array<i64: 32, 96>}, {pipeline_mode = #tpu.pipeline_mode<synchronous>, transform_indices = @transform_3, window_bounds = array<i64: 32, 96>}, {pipeline_mode = #tpu.pipeline_mode<synchronous>, transform_indices = @transform_4, window_bounds = array<i64: 2, 96>}, {pipeline_mode = #tpu.pipeline_mode<synchronous>, transform_indices = @transform_5, window_bounds = array<i64: 1, 32>}, {pipeline_mode = #tpu.pipeline_mode<synchronous>, transform_indices = @transform_6, window_bounds = array<i64: 8, 32>}, {pipeline_mode = #tpu.pipeline_mode<synchronous>, transform_indices = @transform_7, window_bounds = array<i64: 1, 32>}]} {
    %0 = tpu.iota {dimensions = array<i32: 1>} : vector<8x64xi32>
    %c0 = arith.constant 0 : index
    %c0_0 = arith.constant 0 : index
    %1 = vector.load %arg1[%c0, %c0_0] : memref<8x1xi32, #tpu.memory_space<vmem>>, vector<8x1xi32>
    %2 = vector.shape_cast %1 : vector<8x1xi32> to vector<8x1xi32>
    %3 = vector.broadcast %2 : vector<8x1xi32> to vector<8x64xi32>
    %4 = arith.cmpi eq, %0, %3 : vector<8x64xi32>
    %5 = arith.extui %4 : vector<8x64xi1> to vector<8x64xi32>
    %6 = arith.sitofp %5 : vector<8x64xi32> to vector<8x64xf32>
    %c0_1 = arith.constant 0 : index
    %c0_2 = arith.constant 0 : index
    %7 = vector.load %arg2[%c0_1, %c0_2] : memref<64x32xf32, #tpu.memory_space<vmem>>, vector<64x32xf32>
    %cst = arith.constant dense<0.000000e+00> : vector<8x32xf32>
    %8 = tpu.matmul %6, %7, %cst {dimension_numbers = #tpu.dot_dimension_numbers<[1], [0], [0], [1], [0, 0, 1, 1], [], []>} : vector<8x64xf32>, vector<64x32xf32>, vector<8x32xf32> -> vector<8x32xf32>
    %c0_3 = arith.constant 0 : index
    %c0_4 = arith.constant 0 : index
    %9 = vector.load %arg3[%c0_3, %c0_4] : memref<32x96xf32, #tpu.memory_space<vmem>>, vector<32x96xf32>
    %cst_5 = arith.constant dense<0.000000e+00> : vector<8x96xf32>
    %10 = tpu.matmul %8, %9, %cst_5 {dimension_numbers = #tpu.dot_dimension_numbers<[1], [0], [0], [1], [0, 0, 1, 1], [], []>} : vector<8x32xf32>, vector<32x96xf32>, vector<8x96xf32> -> vector<8x96xf32>
    %c0_6 = arith.constant 0 : index
    %c0_7 = arith.constant 0 : index
    %11 = vector.load %arg5[%c0_6, %c0_7] : memref<2x96xf32, #tpu.memory_space<vmem>>, vector<1x96xf32>
    %12 = vector.broadcast %11 : vector<1x96xf32> to vector<8x96xf32>
    %13 = arith.addf %10, %12 : vector<8x96xf32>
    %c0_8 = arith.constant 0 : index
    %c0_9 = arith.constant 0 : index
    %14 = vector.load %arg4[%c0_8, %c0_9] : memref<32x96xf32, #tpu.memory_space<vmem>>, vector<32x96xf32>
    %c1 = arith.constant 1 : index
    %c0_10 = arith.constant 0 : index
    %15 = vector.load %arg5[%c1, %c0_10] : memref<2x96xf32, #tpu.memory_space<vmem>>, vector<1x96xf32>
    %c0_11 = arith.constant 0 : index
    %c0_12 = arith.constant 0 : index
    %16 = vector.load %arg6[%c0_11, %c0_12] : memref<1x32xf32, #tpu.memory_space<vmem>>, vector<1x32xf32>
    %cst_13 = arith.constant dense<0.000000e+00> : vector<1x96xf32>
    %17 = tpu.matmul %16, %14, %cst_13 {dimension_numbers = #tpu.dot_dimension_numbers<[1], [0], [0], [1], [0, 0, 1, 1], [], []>} : vector<1x32xf32>, vector<32x96xf32>, vector<1x96xf32> -> vector<1x96xf32>
    %18 = arith.addf %17, %15 : vector<1x96xf32>
    %19 = vector.extract_strided_slice %13 {offsets = [0, 0], sizes = [1, 64], strides = [1, 1]} : vector<8x96xf32> to vector<1x64xf32>
    %20 = vector.extract_strided_slice %18 {offsets = [0, 0], sizes = [1, 64], strides = [1, 1]} : vector<1x96xf32> to vector<1x64xf32>
    %21 = arith.addf %19, %20 : vector<1x64xf32>
    %22 = arith.negf %21 : vector<1x64xf32>
    %23 = math.exp %22 : vector<1x64xf32>
    %cst_14 = arith.constant 1.000000e+00 : f32
    %24 = vector.broadcast %cst_14 : f32 to vector<1x64xf32>
    %25 = arith.addf %24, %23 : vector<1x64xf32>
    %26 = arith.divf %24, %25 : vector<1x64xf32>
    %27 = vector.extract_strided_slice %26 {offsets = [0, 0], sizes = [1, 32], strides = [1, 1]} : vector<1x64xf32> to vector<1x32xf32>
    %28 = vector.extract_strided_slice %26 {offsets = [0, 32], sizes = [1, 32], strides = [1, 1]} : vector<1x64xf32> to vector<1x32xf32>
    %29 = vector.extract_strided_slice %13 {offsets = [0, 64], sizes = [1, 32], strides = [1, 1]} : vector<8x96xf32> to vector<1x32xf32>
    %30 = vector.extract_strided_slice %18 {offsets = [0, 64], sizes = [1, 32], strides = [1, 1]} : vector<1x96xf32> to vector<1x32xf32>
    %31 = arith.mulf %27, %30 : vector<1x32xf32>
    %32 = arith.addf %29, %31 : vector<1x32xf32>
    %33 = math.tanh %32 : vector<1x32xf32>
    %34 = arith.subf %16, %33 : vector<1x32xf32>
    %35 = arith.mulf %28, %34 : vector<1x32xf32>
    %36 = arith.addf %33, %35 : vector<1x32xf32>
    %c0_15 = arith.constant 0 : index
    %c0_16 = arith.constant 0 : index
    %37 = vector.load %arg7[%c0_15, %c0_16] : memref<8x32xf32, #tpu.memory_space<vmem>>, vector<1x32xf32>
    tpu.vector_store %arg7[%c0_15, %c0_16], %36 {strides = array<i32>} : memref<8x32xf32, #tpu.memory_space<vmem>>, vector<1x32xf32>,
    %cst_17 = arith.constant dense<0.000000e+00> : vector<1x96xf32>
    %38 = tpu.matmul %36, %14, %cst_17 {dimension_numbers = #tpu.dot_dimension_numbers<[1], [0], [0], [1], [0, 0, 1, 1], [], []>} : vector<1x32xf32>, vector<32x96xf32>, vector<1x96xf32> -> vector<1x96xf32>
    %39 = arith.addf %38, %15 : vector<1x96xf32>
    %40 = vector.extract_strided_slice %13 {offsets = [1, 0], sizes = [1, 64], strides = [1, 1]} : vector<8x96xf32> to vector<1x64xf32>
    %41 = vector.extract_strided_slice %39 {offsets = [0, 0], sizes = [1, 64], strides = [1, 1]} : vector<1x96xf32> to vector<1x64xf32>
    %42 = arith.addf %40, %41 : vector<1x64xf32>
    %43 = arith.negf %42 : vector<1x64xf32>
    %44 = math.exp %43 : vector<1x64xf32>
    %cst_18 = arith.constant 1.000000e+00 : f32
    %45 = vector.broadcast %cst_18 : f32 to vector<1x64xf32>
    %46 = arith.addf %45, %44 : vector<1x64xf32>
    %47 = arith.divf %45, %46 : vector<1x64xf32>
    %48 = vector.extract_strided_slice %47 {offsets = [0, 0], sizes = [1, 32], strides = [1, 1]} : vector<1x64xf32> to vector<1x32xf32>
    %49 = vector.extract_strided_slice %47 {offsets = [0, 32], sizes = [1, 32], strides = [1, 1]} : vector<1x64xf32> to vector<1x32xf32>
    %50 = vector.extract_strided_slice %13 {offsets = [1, 64], sizes = [1, 32], strides = [1, 1]} : vector<8x96xf32> to vector<1x32xf32>
    %51 = vector.extract_strided_slice %39 {offsets = [0, 64], sizes = [1, 32], strides = [1, 1]} : vector<1x96xf32> to vector<1x32xf32>
    %52 = arith.mulf %48, %51 : vector<1x32xf32>
    %53 = arith.addf %50, %52 : vector<1x32xf32>
    %54 = math.tanh %53 : vector<1x32xf32>
    %55 = arith.subf %36, %54 : vector<1x32xf32>
    %56 = arith.mulf %49, %55 : vector<1x32xf32>
    %57 = arith.addf %54, %56 : vector<1x32xf32>
    %c1_19 = arith.constant 1 : index
    %c0_20 = arith.constant 0 : index
    %58 = vector.load %arg7[%c1_19, %c0_20] : memref<8x32xf32, #tpu.memory_space<vmem>>, vector<1x32xf32>
    tpu.vector_store %arg7[%c1_19, %c0_20], %57 {strides = array<i32>} : memref<8x32xf32, #tpu.memory_space<vmem>>, vector<1x32xf32>,
    %cst_21 = arith.constant dense<0.000000e+00> : vector<1x96xf32>
    %59 = tpu.matmul %57, %14, %cst_21 {dimension_numbers = #tpu.dot_dimension_numbers<[1], [0], [0], [1], [0, 0, 1, 1], [], []>} : vector<1x32xf32>, vector<32x96xf32>, vector<1x96xf32> -> vector<1x96xf32>
    %60 = arith.addf %59, %15 : vector<1x96xf32>
    %61 = vector.extract_strided_slice %13 {offsets = [2, 0], sizes = [1, 64], strides = [1, 1]} : vector<8x96xf32> to vector<1x64xf32>
    %62 = vector.extract_strided_slice %60 {offsets = [0, 0], sizes = [1, 64], strides = [1, 1]} : vector<1x96xf32> to vector<1x64xf32>
    %63 = arith.addf %61, %62 : vector<1x64xf32>
    %64 = arith.negf %63 : vector<1x64xf32>
    %65 = math.exp %64 : vector<1x64xf32>
    %cst_22 = arith.constant 1.000000e+00 : f32
    %66 = vector.broadcast %cst_22 : f32 to vector<1x64xf32>
    %67 = arith.addf %66, %65 : vector<1x64xf32>
    %68 = arith.divf %66, %67 : vector<1x64xf32>
    %69 = vector.extract_strided_slice %68 {offsets = [0, 0], sizes = [1, 32], strides = [1, 1]} : vector<1x64xf32> to vector<1x32xf32>
    %70 = vector.extract_strided_slice %68 {offsets = [0, 32], sizes = [1, 32], strides = [1, 1]} : vector<1x64xf32> to vector<1x32xf32>
    %71 = vector.extract_strided_slice %13 {offsets = [2, 64], sizes = [1, 32], strides = [1, 1]} : vector<8x96xf32> to vector<1x32xf32>
    %72 = vector.extract_strided_slice %60 {offsets = [0, 64], sizes = [1, 32], strides = [1, 1]} : vector<1x96xf32> to vector<1x32xf32>
    %73 = arith.mulf %69, %72 : vector<1x32xf32>
    %74 = arith.addf %71, %73 : vector<1x32xf32>
    %75 = math.tanh %74 : vector<1x32xf32>
    %76 = arith.subf %57, %75 : vector<1x32xf32>
    %77 = arith.mulf %70, %76 : vector<1x32xf32>
    %78 = arith.addf %75, %77 : vector<1x32xf32>
    %c2 = arith.constant 2 : index
    %c0_23 = arith.constant 0 : index
    %79 = vector.load %arg7[%c2, %c0_23] : memref<8x32xf32, #tpu.memory_space<vmem>>, vector<1x32xf32>
    tpu.vector_store %arg7[%c2, %c0_23], %78 {strides = array<i32>} : memref<8x32xf32, #tpu.memory_space<vmem>>, vector<1x32xf32>,
    %cst_24 = arith.constant dense<0.000000e+00> : vector<1x96xf32>
    %80 = tpu.matmul %78, %14, %cst_24 {dimension_numbers = #tpu.dot_dimension_numbers<[1], [0], [0], [1], [0, 0, 1, 1], [], []>} : vector<1x32xf32>, vector<32x96xf32>, vector<1x96xf32> -> vector<1x96xf32>
    %81 = arith.addf %80, %15 : vector<1x96xf32>
    %82 = vector.extract_strided_slice %13 {offsets = [3, 0], sizes = [1, 64], strides = [1, 1]} : vector<8x96xf32> to vector<1x64xf32>
    %83 = vector.extract_strided_slice %81 {offsets = [0, 0], sizes = [1, 64], strides = [1, 1]} : vector<1x96xf32> to vector<1x64xf32>
    %84 = arith.addf %82, %83 : vector<1x64xf32>
    %85 = arith.negf %84 : vector<1x64xf32>
    %86 = math.exp %85 : vector<1x64xf32>
    %cst_25 = arith.constant 1.000000e+00 : f32
    %87 = vector.broadcast %cst_25 : f32 to vector<1x64xf32>
    %88 = arith.addf %87, %86 : vector<1x64xf32>
    %89 = arith.divf %87, %88 : vector<1x64xf32>
    %90 = vector.extract_strided_slice %89 {offsets = [0, 0], sizes = [1, 32], strides = [1, 1]} : vector<1x64xf32> to vector<1x32xf32>
    %91 = vector.extract_strided_slice %89 {offsets = [0, 32], sizes = [1, 32], strides = [1, 1]} : vector<1x64xf32> to vector<1x32xf32>
    %92 = vector.extract_strided_slice %13 {offsets = [3, 64], sizes = [1, 32], strides = [1, 1]} : vector<8x96xf32> to vector<1x32xf32>
    %93 = vector.extract_strided_slice %81 {offsets = [0, 64], sizes = [1, 32], strides = [1, 1]} : vector<1x96xf32> to vector<1x32xf32>
    %94 = arith.mulf %90, %93 : vector<1x32xf32>
    %95 = arith.addf %92, %94 : vector<1x32xf32>
    %96 = math.tanh %95 : vector<1x32xf32>
    %97 = arith.subf %78, %96 : vector<1x32xf32>
    %98 = arith.mulf %91, %97 : vector<1x32xf32>
    %99 = arith.addf %96, %98 : vector<1x32xf32>
    %c3 = arith.constant 3 : index
    %c0_26 = arith.constant 0 : index
    %100 = vector.load %arg7[%c3, %c0_26] : memref<8x32xf32, #tpu.memory_space<vmem>>, vector<1x32xf32>
    tpu.vector_store %arg7[%c3, %c0_26], %99 {strides = array<i32>} : memref<8x32xf32, #tpu.memory_space<vmem>>, vector<1x32xf32>,
    %cst_27 = arith.constant dense<0.000000e+00> : vector<1x96xf32>
    %101 = tpu.matmul %99, %14, %cst_27 {dimension_numbers = #tpu.dot_dimension_numbers<[1], [0], [0], [1], [0, 0, 1, 1], [], []>} : vector<1x32xf32>, vector<32x96xf32>, vector<1x96xf32> -> vector<1x96xf32>
    %102 = arith.addf %101, %15 : vector<1x96xf32>
    %103 = vector.extract_strided_slice %13 {offsets = [4, 0], sizes = [1, 64], strides = [1, 1]} : vector<8x96xf32> to vector<1x64xf32>
    %104 = vector.extract_strided_slice %102 {offsets = [0, 0], sizes = [1, 64], strides = [1, 1]} : vector<1x96xf32> to vector<1x64xf32>
    %105 = arith.addf %103, %104 : vector<1x64xf32>
    %106 = arith.negf %105 : vector<1x64xf32>
    %107 = math.exp %106 : vector<1x64xf32>
    %cst_28 = arith.constant 1.000000e+00 : f32
    %108 = vector.broadcast %cst_28 : f32 to vector<1x64xf32>
    %109 = arith.addf %108, %107 : vector<1x64xf32>
    %110 = arith.divf %108, %109 : vector<1x64xf32>
    %111 = vector.extract_strided_slice %110 {offsets = [0, 0], sizes = [1, 32], strides = [1, 1]} : vector<1x64xf32> to vector<1x32xf32>
    %112 = vector.extract_strided_slice %110 {offsets = [0, 32], sizes = [1, 32], strides = [1, 1]} : vector<1x64xf32> to vector<1x32xf32>
    %113 = vector.extract_strided_slice %13 {offsets = [4, 64], sizes = [1, 32], strides = [1, 1]} : vector<8x96xf32> to vector<1x32xf32>
    %114 = vector.extract_strided_slice %102 {offsets = [0, 64], sizes = [1, 32], strides = [1, 1]} : vector<1x96xf32> to vector<1x32xf32>
    %115 = arith.mulf %111, %114 : vector<1x32xf32>
    %116 = arith.addf %113, %115 : vector<1x32xf32>
    %117 = math.tanh %116 : vector<1x32xf32>
    %118 = arith.subf %99, %117 : vector<1x32xf32>
    %119 = arith.mulf %112, %118 : vector<1x32xf32>
    %120 = arith.addf %117, %119 : vector<1x32xf32>
    %c4 = arith.constant 4 : index
    %c0_29 = arith.constant 0 : index
    %121 = vector.load %arg7[%c4, %c0_29] : memref<8x32xf32, #tpu.memory_space<vmem>>, vector<1x32xf32>
    tpu.vector_store %arg7[%c4, %c0_29], %120 {strides = array<i32>} : memref<8x32xf32, #tpu.memory_space<vmem>>, vector<1x32xf32>,
    %cst_30 = arith.constant dense<0.000000e+00> : vector<1x96xf32>
    %122 = tpu.matmul %120, %14, %cst_30 {dimension_numbers = #tpu.dot_dimension_numbers<[1], [0], [0], [1], [0, 0, 1, 1], [], []>} : vector<1x32xf32>, vector<32x96xf32>, vector<1x96xf32> -> vector<1x96xf32>
    %123 = arith.addf %122, %15 : vector<1x96xf32>
    %124 = vector.extract_strided_slice %13 {offsets = [5, 0], sizes = [1, 64], strides = [1, 1]} : vector<8x96xf32> to vector<1x64xf32>
    %125 = vector.extract_strided_slice %123 {offsets = [0, 0], sizes = [1, 64], strides = [1, 1]} : vector<1x96xf32> to vector<1x64xf32>
    %126 = arith.addf %124, %125 : vector<1x64xf32>
    %127 = arith.negf %126 : vector<1x64xf32>
    %128 = math.exp %127 : vector<1x64xf32>
    %cst_31 = arith.constant 1.000000e+00 : f32
    %129 = vector.broadcast %cst_31 : f32 to vector<1x64xf32>
    %130 = arith.addf %129, %128 : vector<1x64xf32>
    %131 = arith.divf %129, %130 : vector<1x64xf32>
    %132 = vector.extract_strided_slice %131 {offsets = [0, 0], sizes = [1, 32], strides = [1, 1]} : vector<1x64xf32> to vector<1x32xf32>
    %133 = vector.extract_strided_slice %131 {offsets = [0, 32], sizes = [1, 32], strides = [1, 1]} : vector<1x64xf32> to vector<1x32xf32>
    %134 = vector.extract_strided_slice %13 {offsets = [5, 64], sizes = [1, 32], strides = [1, 1]} : vector<8x96xf32> to vector<1x32xf32>
    %135 = vector.extract_strided_slice %123 {offsets = [0, 64], sizes = [1, 32], strides = [1, 1]} : vector<1x96xf32> to vector<1x32xf32>
    %136 = arith.mulf %132, %135 : vector<1x32xf32>
    %137 = arith.addf %134, %136 : vector<1x32xf32>
    %138 = math.tanh %137 : vector<1x32xf32>
    %139 = arith.subf %120, %138 : vector<1x32xf32>
    %140 = arith.mulf %133, %139 : vector<1x32xf32>
    %141 = arith.addf %138, %140 : vector<1x32xf32>
    %c5 = arith.constant 5 : index
    %c0_32 = arith.constant 0 : index
    %142 = vector.load %arg7[%c5, %c0_32] : memref<8x32xf32, #tpu.memory_space<vmem>>, vector<1x32xf32>
    tpu.vector_store %arg7[%c5, %c0_32], %141 {strides = array<i32>} : memref<8x32xf32, #tpu.memory_space<vmem>>, vector<1x32xf32>,
    %cst_33 = arith.constant dense<0.000000e+00> : vector<1x96xf32>
    %143 = tpu.matmul %141, %14, %cst_33 {dimension_numbers = #tpu.dot_dimension_numbers<[1], [0], [0], [1], [0, 0, 1, 1], [], []>} : vector<1x32xf32>, vector<32x96xf32>, vector<1x96xf32> -> vector<1x96xf32>
    %144 = arith.addf %143, %15 : vector<1x96xf32>
    %145 = vector.extract_strided_slice %13 {offsets = [6, 0], sizes = [1, 64], strides = [1, 1]} : vector<8x96xf32> to vector<1x64xf32>
    %146 = vector.extract_strided_slice %144 {offsets = [0, 0], sizes = [1, 64], strides = [1, 1]} : vector<1x96xf32> to vector<1x64xf32>
    %147 = arith.addf %145, %146 : vector<1x64xf32>
    %148 = arith.negf %147 : vector<1x64xf32>
    %149 = math.exp %148 : vector<1x64xf32>
    %cst_34 = arith.constant 1.000000e+00 : f32
    %150 = vector.broadcast %cst_34 : f32 to vector<1x64xf32>
    %151 = arith.addf %150, %149 : vector<1x64xf32>
    %152 = arith.divf %150, %151 : vector<1x64xf32>
    %153 = vector.extract_strided_slice %152 {offsets = [0, 0], sizes = [1, 32], strides = [1, 1]} : vector<1x64xf32> to vector<1x32xf32>
    %154 = vector.extract_strided_slice %152 {offsets = [0, 32], sizes = [1, 32], strides = [1, 1]} : vector<1x64xf32> to vector<1x32xf32>
    %155 = vector.extract_strided_slice %13 {offsets = [6, 64], sizes = [1, 32], strides = [1, 1]} : vector<8x96xf32> to vector<1x32xf32>
    %156 = vector.extract_strided_slice %144 {offsets = [0, 64], sizes = [1, 32], strides = [1, 1]} : vector<1x96xf32> to vector<1x32xf32>
    %157 = arith.mulf %153, %156 : vector<1x32xf32>
    %158 = arith.addf %155, %157 : vector<1x32xf32>
    %159 = math.tanh %158 : vector<1x32xf32>
    %160 = arith.subf %141, %159 : vector<1x32xf32>
    %161 = arith.mulf %154, %160 : vector<1x32xf32>
    %162 = arith.addf %159, %161 : vector<1x32xf32>
    %c6 = arith.constant 6 : index
    %c0_35 = arith.constant 0 : index
    %163 = vector.load %arg7[%c6, %c0_35] : memref<8x32xf32, #tpu.memory_space<vmem>>, vector<1x32xf32>
    tpu.vector_store %arg7[%c6, %c0_35], %162 {strides = array<i32>} : memref<8x32xf32, #tpu.memory_space<vmem>>, vector<1x32xf32>,
    %cst_36 = arith.constant dense<0.000000e+00> : vector<1x96xf32>
    %164 = tpu.matmul %162, %14, %cst_36 {dimension_numbers = #tpu.dot_dimension_numbers<[1], [0], [0], [1], [0, 0, 1, 1], [], []>} : vector<1x32xf32>, vector<32x96xf32>, vector<1x96xf32> -> vector<1x96xf32>
    %165 = arith.addf %164, %15 : vector<1x96xf32>
    %166 = vector.extract_strided_slice %13 {offsets = [7, 0], sizes = [1, 64], strides = [1, 1]} : vector<8x96xf32> to vector<1x64xf32>
    %167 = vector.extract_strided_slice %165 {offsets = [0, 0], sizes = [1, 64], strides = [1, 1]} : vector<1x96xf32> to vector<1x64xf32>
    %168 = arith.addf %166, %167 : vector<1x64xf32>
    %169 = arith.negf %168 : vector<1x64xf32>
    %170 = math.exp %169 : vector<1x64xf32>
    %cst_37 = arith.constant 1.000000e+00 : f32
    %171 = vector.broadcast %cst_37 : f32 to vector<1x64xf32>
    %172 = arith.addf %171, %170 : vector<1x64xf32>
    %173 = arith.divf %171, %172 : vector<1x64xf32>
    %174 = vector.extract_strided_slice %173 {offsets = [0, 0], sizes = [1, 32], strides = [1, 1]} : vector<1x64xf32> to vector<1x32xf32>
    %175 = vector.extract_strided_slice %173 {offsets = [0, 32], sizes = [1, 32], strides = [1, 1]} : vector<1x64xf32> to vector<1x32xf32>
    %176 = vector.extract_strided_slice %13 {offsets = [7, 64], sizes = [1, 32], strides = [1, 1]} : vector<8x96xf32> to vector<1x32xf32>
    %177 = vector.extract_strided_slice %165 {offsets = [0, 64], sizes = [1, 32], strides = [1, 1]} : vector<1x96xf32> to vector<1x32xf32>
    %178 = arith.mulf %174, %177 : vector<1x32xf32>
    %179 = arith.addf %176, %178 : vector<1x32xf32>
    %180 = math.tanh %179 : vector<1x32xf32>
    %181 = arith.subf %162, %180 : vector<1x32xf32>
    %182 = arith.mulf %175, %181 : vector<1x32xf32>
    %183 = arith.addf %180, %182 : vector<1x32xf32>
    %c7 = arith.constant 7 : index
    %c0_38 = arith.constant 0 : index
    %184 = vector.load %arg7[%c7, %c0_38] : memref<8x32xf32, #tpu.memory_space<vmem>>, vector<1x32xf32>
    tpu.vector_store %arg7[%c7, %c0_38], %183 {strides = array<i32>} : memref<8x32xf32, #tpu.memory_space<vmem>>, vector<1x32xf32>,
    %c0_39 = arith.constant 0 : index
    %c0_40 = arith.constant 0 : index
    %185 = vector.load %arg8[%c0_39, %c0_40] : memref<1x32xf32, #tpu.memory_space<vmem>>, vector<1x32xf32>
    tpu.vector_store %arg8[%c0_39, %c0_40], %183 {strides = array<i32>} : memref<1x32xf32, #tpu.memory_space<vmem>>, vector<1x32xf32>,
    return
  }
  func.func @transform_0(%arg0: i32) -> (i32, i32) {
    %c0_i32 = arith.constant 0 : i32
    %c0_i32_0 = arith.constant 0 : i32
    %c0_i32_1 = arith.constant 0 : i32
    return %c0_i32, %c0_i32_0 : i32, i32
  }
  func.func @transform_1(%arg0: i32) -> (i32, i32) {
    %c0_i32 = arith.constant 0 : i32
    %c0_i32_0 = arith.constant 0 : i32
    %c0_i32_1 = arith.constant 0 : i32
    return %c0_i32, %c0_i32_0 : i32, i32
  }
  func.func @transform_2(%arg0: i32) -> (i32, i32) {
    %c0_i32 = arith.constant 0 : i32
    %c0_i32_0 = arith.constant 0 : i32
    %c0_i32_1 = arith.constant 0 : i32
    return %c0_i32, %c0_i32_0 : i32, i32
  }
  func.func @transform_3(%arg0: i32) -> (i32, i32) {
    %c0_i32 = arith.constant 0 : i32
    %c0_i32_0 = arith.constant 0 : i32
    %c0_i32_1 = arith.constant 0 : i32
    return %c0_i32, %c0_i32_0 : i32, i32
  }
  func.func @transform_4(%arg0: i32) -> (i32, i32) {
    %c0_i32 = arith.constant 0 : i32
    %c0_i32_0 = arith.constant 0 : i32
    %c0_i32_1 = arith.constant 0 : i32
    return %c0_i32, %c0_i32_0 : i32, i32
  }
  func.func @transform_5(%arg0: i32) -> (i32, i32) {
    %c0_i32 = arith.constant 0 : i32
    %c0_i32_0 = arith.constant 0 : i32
    %c0_i32_1 = arith.constant 0 : i32
    return %c0_i32, %c0_i32_0 : i32, i32
  }
  func.func @transform_6(%arg0: i32) -> (i32, i32) {
    %c0_i32 = arith.constant 0 : i32
    %c0_i32_0 = arith.constant 0 : i32
    %c0_i32_1 = arith.constant 0 : i32
    return %c0_i32, %c0_i32_0 : i32, i32
  }
  func.func @transform_7(%arg0: i32) -> (i32, i32) {
    %c0_i32 = arith.constant 0 : i32
    %c0_i32_0 = arith.constant 0 : i32
    %c0_i32_1 = arith.constant 0 : i32
    return %c0_i32, %c0_i32_0 : i32, i32
  }
}

</mosaic_0001>

<bundles_post_ra>
// kernel: tpu_custom_call.1
= control target key start
LH: loop header
LB: loop body
LE: loop exit
PB: predicated region body
PF: predicated region fallthrough
CT: control target
= control target key end

     0   :  { %13 = vsyncpa [#allocation3], 0  ;;  %v1540_v3 = vmov 0   ;;  %v1541_v4 = vmov 0.0|0.0   ;;  %vm1542_vm0 = vmmov 0   ;;  %v1543_v11 = vmov 0.0   ;;  %s1849_s0 = inlined_call_operand.vmem [shape: s32[8,1], index: 0, kind: input, shape index: {}]   ;;  %s1850_s1 = inlined_call_operand.vmem [shape: f32[64,32], index: 1, kind: input, shape index: {}]   ;;  %s1851_s2 = inlined_call_operand.vmem [shape: f32[32,96], index: 2, kind: input, shape index: {}]   ;;  %s1852_s3 = inlined_call_operand.vmem [shape: f32[32,96], index: 3, kind: input, shape index: {}]   ;;  %s1853_s4 = inlined_call_operand.vmem [shape: f32[2,96], index: 4, kind: input, shape index: {}]   ;;  %s1854_s5 = inlined_call_operand.vmem [shape: f32[1,32], index: 5, kind: input, shape index: {}]   ;;  %s1855_s6 = inlined_call_operand.hbm [shape: f32[8,32], index: 6, kind: output, shape index: {0}]   ;;  %s1856_s7 = inlined_call_operand.hbm [shape: f32[1,32], index: 7, kind: output, shape index: {1}]  }
   0x1   :  { %v29_v0 = vld [vmem:[%s1849_s0] sm:$0xff]  ;;  %v37_v2 = vld [vmem:[%s1850_s1 + $0x8] sm:$0xff]  ;;  %1443 = vset.pattern.permute.xlu0 %v1540_v3  ;;  %1367 = vmatprep.subr.bf16.mxu0 %v1541_v4  ;;  %v38_v6 = vld [vmem:[%s1850_s1 + $0x10] sm:$0xff] }
   0x2   :  { %v36_v1 = vld [vmem:[%s1850_s1] sm:$0xff]  ;;  %v39_v7 = vld [vmem:[%s1850_s1 + $0x18] sm:$0xff]  ;;  %31 = vperm.xlu0 %1443, %v29_v0   ;;  %1379 = vmatprep.subr.bf16.mxu1 %v1541_v4  ;;  %v41_v10 = vld [vmem:[%s1850_s1 + $0x28] sm:$0xff] }
   0x3   :  { %v1368_v5 = vpack.c.bf16 %v37_v2, %v36_v1  ;;  %v1371_v8 = vpack.c.bf16 %v39_v7, %v38_v6  ;;  %v40_v9 = vld [vmem:[%s1850_s1 + $0x20] sm:$0xff]  ;;  %1265 = vmatprep.mubr.msk.f32.mxu0 %vm1542_vm0, %v1543_v11 }
   0x5   :  { %1369 = vmatpush3.bf16.msra.mxu0 %v1368_v5 }
   0x6   :  { %14 = vsyncpa [#allocation5], 0  ;;  %1370 = vmatprep.subr.bf16.mxu0 %v1541_v4  ;;  %v118_v12 = vld [vmem:[%s1851_s2] sm:$0xff]  ;;  %v119_v13 = vld [vmem:[%s1851_s2 + $0x8] sm:$0xff]  ;;  %1276 = vmatprep.mubr.msk.f32.mxu1 %vm1542_vm0, %v1543_v11  ;;  %v1374_v17 = vpack.c.bf16 %v41_v10, %v40_v9  ;;  %v27_v22 = vlaneseq  ;;  %vm44_vm1 = vcmask 523264   ;;  %vm127_vm3 = vcmask 261120  }
   0x7   :  { %v120_v14 = vld [vmem:[%s1851_s2 + $0x10] sm:$0xff]  ;;  %v1380_v15 = vpack.c.bf16 %v119_v13, %v118_v12  ;;  %v121_v16 = vld [vmem:[%s1851_s2 + $0x18] sm:$0xff]  ;;  %v201_v26 = vld [vmem:[%s1852_s3] sm:$0xff]  ;;  %v1545_v52 = vmov 1966171168   ;;  %vm335_vm4 = vcmask 253952  }
   0x8   :  { %v1383_v18 = vpack.c.bf16 %v121_v16, %v120_v14  ;;  %v42_v19 = vld [vmem:[%s1850_s1 + $0x30] sm:$0xff]  ;;  %v43_v20 = vld [vmem:[%s1850_s1 + $0x38] sm:$0xff]  ;;  %v28_v23 = vand.u32 127, %v27_v22  ;;  %v202_v27 = vld [vmem:[%s1852_s3 + $0x8] sm:$0xff]  ;;  %v300_v53 = vunpack.c.l.s4 %v1545_v52  ;;  %v303_v54 = vshrl.u32 %v27_v22, 7  ;;  %s1547_s13 = smov 96  }
   0x9   :  { %1372 = vmatpush3.bf16.msra.mxu0 %v1371_v8  ;;  %1381 = vmatpush3.bf16.msra.mxu1 %v1380_v15  ;;  %v1377_v21 = vpack.c.bf16 %v43_v20, %v42_v19  ;;  %v1650_v28 = vpack.c.bf16 %v202_v27, %v201_v26  ;;  %v203_v29 = vld [vmem:[%s1852_s3 + $0x10] sm:$0xff]  ;;  %v204_v30 = vld [vmem:[%s1852_s3 + $0x18] sm:$0xff]  ;;  %v206_v34 = vld [vmem:[%s1854_s5] sm:$0x1]  ;;  %s1544_s5 = smov 64   ;;  %vm448_vm5 = vcmask 254977  }
   0xa   :  { %1373 = vmatprep.subr.bf16.mxu0 %v1541_v4  ;;  %1382 = vmatprep.subr.bf16.mxu1 %v1541_v4  ;;  %v1660_v31 = vpack.c.bf16 %v204_v30, %v203_v29  ;;  %v1684_v37 = vld [vmem:[%s1853_s4 + $0x1] sm:$0x1]  ;;  %v1177_v41 = vld [vmem:[%s1853_s4] ss:$0 sm:$0xff]  ;;  %v301_v55 = vunpack.c.0.s8 %v300_v53  ;;  %v320_v60 = vsub.s32 0, %v303_v54  ;;  %s1546_s4 = smov 32  }
   0xb   :  { %vm680_vm6 = vcmask 257027   ;;  %vm912_vm7 = vcmask 259077   ;;  %vm564_vm8 = vcmask 256002   ;;  %vm796_vm9 = vcmask 258052   ;;  %s1548_s14 = smov [#allocation2]   ;;  %s1549_s16 = smov [#allocation4]  }
   0xc   :  { %v304_v56 = vsub.s32 %v301_v55, %v303_v54  ;;  %vm1028_vm10 = vcmask 260102   ;;  %s1153_s15 = sshll.u32 %s1548_s14, 4  ;;  %s1163_s17 = sshll.u32 %s1549_s16, 4  ;;  %vm1144_vm11 = vcmask 261127   ;;  %s1154_s15 = int_to_ptr.vmem [resolvable:$true] %s1153_s15  ;;  %s1817_s17 = int_to_ptr.vmem [resolvable:$true] %s1163_s17 }
   0xd   :  { %1375 = vmatpush3.bf16.msra.mxu0 %v1374_v17  ;;  %1384 = vmatpush3.bf16.msra.mxu1 %v1383_v18  ;;  %s1492_s18 = scalar_lea.vmem %s1154_s15, 128  ;;  %p1497_p1 = scmp.lt.s32.totalorder %s1154_s15, %s1154_s15 }
   0xe   :  { %1376 = vmatprep.subr.bf16.mxu0 %v1541_v4  ;;  %1385 = vmatprep.subr.bf16.mxu1 %v1541_v4  ;;  %p1493_p0 = scmp.ne.s32.totalorder %s1154_s15, %s1492_s18  ;;  %p1498_p2 = scmp.lt.s32.totalorder %s1492_s18, %s1492_s18 }
  0x10   :  { %p1499_p3 = por %p1498_p2, %p1497_p1 }
  0x11   :  { %1378 = vmatpush3.bf16.msra.mxu0 %v1377_v21 }
  0x12   :  { %1391 = vmatprep.subr.bf16.mxu0 %v1541_v4  ;;  %p1500_p4 = pnand %p1499_p3, %p1493_p0 }
  0x81   :  { %v32_v24 = vpop.permute.xlu0 %31 }
  0x82   :  { %vm33_vm2 = vcmp.eq.s32.totalorder %v28_v23, %v32_v24 }
  0x83   :  { %v1175_v25 = vsel %vm33_vm2, 1.0, %v1543_v11 }
  0x84   :  { %1266 = vmatmul.mubr.msk.f32.vlgmr.msra.gmra.mrb[0].mxu0 %vm44_vm1, %v1175_v25 }
  0x85   :  { %1298 = vmatprep.mubr.msk.f32.mxu0 %vm1542_vm0, %v1543_v11  ;;  %1393 = vmatpush3.bf16.msra.mxu0 %v1650_v28 }
  0x86   :  { %1394 = vmatprep.subr.bf16.mxu0 %v1541_v4 }
  0x89   :  { %1396 = vmatpush3.bf16.msra.mxu0 %v1660_v31 }
  0x8a   :  { %1403 = vmatprep.subr.bf16.mxu0 %v1541_v4 }
 0x157   :  { %v114_v32 = vpop.f32.mrb[0].mxu0 }
 0x158   :  { %v1267_v33 = vpop.f32.mrb[1].mxu0  ;;  %1277 = vmatmul.mubr.msk.f32.vlgmr.msra.gmra.mrb[0].mxu1 %vm127_vm3, %v114_v32 }
 0x159   :  { %1387 = vmatpush3.bf16.msra.mxu1 %v1650_v28  ;;  %1287 = vmatprep.mubr.msk.f32.mxu1 %vm1542_vm0, %v1543_v11 }
 0x15a   :  { %1388 = vmatprep.subr.bf16.mxu1 %v1541_v4 }
 0x15d   :  { %1390 = vmatpush3.bf16.msra.mxu1 %v1660_v31 }
 0x15e   :  { %1397 = vmatprep.subr.bf16.mxu1 %v1541_v4 }
 0x160   :  { %1288 = vmatmul.mubr.msk.f32.vlgmr.msra.gmra.mrb[2].mxu1 %vm127_vm3, %v206_v34 }
 0x161   :  { %1399 = vmatpush3.bf16.msra.mxu1 %v1650_v28  ;;  %1309 = vmatprep.mubr.msk.f32.mxu1 %vm1542_vm0, %v1543_v11 }
 0x162   :  { %1400 = vmatprep.subr.bf16.mxu1 %v1541_v4 }
 0x165   :  { %1402 = vmatpush3.bf16.msra.mxu1 %v1660_v31 }
 0x166   :  { %1409 = vmatprep.subr.bf16.mxu1 %v1541_v4 }
 0x22b   :  { %v197_v35 = vpop.f32.mrb[0].mxu1 }
 0x22c   :  { %v1278_v36 = vpop.f32.mrb[1].mxu1  ;;  %v1691_v42 = vadd.f32 %v1177_v41, %v197_v35 }
 0x233   :  { %v276_v38 = vpop.f32.mrb[2].mxu1 }
 0x234   :  { %v277_v39 = vadd.f32 %v276_v38, %v1684_v37  ;;  %v1289_v40 = vpop.f32.mrb[3].mxu1 }
 0x236   :  { %288 = vrot.lane.b32.xlu0 %v277_v39, %s1544_s5  ;;  %v280_v43 = vadd.f32 %v277_v39, %v1691_v42 }
 0x238   :  { %v1180_v44 = vmul.f32 -1.442695, %v280_v43 }
 0x23a   :  { %1444 = vpow2.f32 %v1180_v44 }
 0x244   :  { %v1445_v45 = vpop.eup %1444 }
 0x245   :  { %v284_v46 = vadd.f32 1.0, %v1445_v45 }
 0x247   :  { %1446 = vrcp.f32 %v284_v46 }
 0x251   :  { %v1447_v47 = vpop.eup %1446 }
 0x2a8   :  { %v289_v48 = vpop.permute.xlu0 %288 }
 0x2a9   :  { %v291_v49 = vmul.f32 %v1447_v47, %v289_v48 }
 0x2ab   :  { %293 = vrot.lane.b32.xlu1 %v291_v49, %s1544_s5 }
 0x31d   :  { %v294_v50 = vpop.permute.xlu1 %293 }
 0x31e   :  { %v296_v51 = vadd.f32 %v294_v50, %v1691_v42 }
 0x320   :  { %1448 = vtanh.f32 %v296_v51 }
 0x32a   :  { %v1449_v57 = vpop.eup %1448 }
 0x32b   :  { %v305_v58 = vrot.slane %v1449_v57, %v304_v56 }
 0x32d   :  { %v312_v59 = vrot.slane %v305_v58, %v304_v56 }
 0x32f   :  { %313 = vrot.lane.b32.xlu1 %v312_v59, %s1544_s5 }
 0x3a1   :  { %v314_v61 = vpop.permute.xlu1 %313 }
 0x3a2   :  { %v316_v62 = vsub.f32 %v206_v34, %v314_v61 }
 0x3a4   :  { %v321_v63 = vrot.slane %v316_v62, %v320_v60 }
 0x3a6   :  { %322 = vrot.lane.b32.xlu0 %v321_v63, %s1546_s4 }
 0x418   :  { %v323_v0 = vpop.permute.xlu0 %322 }
 0x419   :  { %v325_v1 = vmul.f32 %v1447_v47, %v323_v0 }
 0x41b   :  { %327 = vrot.lane.b32.xlu1 %v325_v1, %s1546_s4 }
 0x48d   :  { %v328_v2 = vpop.permute.xlu1 %327 }
 0x48e   :  { %v330_v3 = vadd.f32 %v1449_v57, %v328_v2 }
 0x490   :  { %332 = vrot.lane.b32.xlu0 %v330_v3, %s1544_s5 }
 0x502   :  { %v333_v5 = vpop.permute.xlu0 %332 }
 0x503   :  { %336 = vst.msk [vmem:[#allocation2] sm:$0x1] %vm335_vm4, %v333_v5  ;;  %1299 = vmatmul.mubr.msk.f32.vlgmr.msra.gmra.mrb[2].mxu0 %vm127_vm3, %v333_v5 }
 0x504   :  { %1405 = vmatpush3.bf16.msra.mxu0 %v1650_v28  ;;  %1320 = vmatprep.mubr.msk.f32.mxu0 %vm1542_vm0, %v1543_v11 }
 0x505   :  { %1406 = vmatprep.subr.bf16.mxu0 %v1541_v4 }
 0x508   :  { %1408 = vmatpush3.bf16.msra.mxu0 %v1660_v31 }
 0x509   :  { %1415 = vmatprep.subr.bf16.mxu0 %v1541_v4 }
 0x5d6   :  { %v405_v6 = vpop.f32.mrb[2].mxu0 }
 0x5d7   :  { %v406_v7 = vadd.f32 %v405_v6, %v1684_v37  ;;  %v1300_v8 = vpop.f32.mrb[3].mxu0 }
 0x5d9   :  { %v410_v9 = vrot.slane %v406_v7, 7 }
 0x5db   :  { %419 = vrot.lane.b32.xlu1 %v410_v9, %s1544_s5  ;;  %v412_v10 = vadd.f32 %v410_v9, %v1691_v42 }
 0x5dd   :  { %v1182_v12 = vmul.f32 -1.442695, %v412_v10 }
 0x5df   :  { %1450 = vpow2.f32 %v1182_v12 }
 0x5e9   :  { %v1451_v13 = vpop.eup %1450 }
 0x5ea   :  { %v416_v14 = vadd.f32 1.0, %v1451_v13 }
 0x5ec   :  { %1452 = vrcp.f32 %v416_v14 }
 0x5f6   :  { %v1453_v15 = vpop.eup %1452 }
 0x64d   :  { %v420_v16 = vpop.permute.xlu1 %419 }
 0x64e   :  { %v422_v17 = vmul.f32 %v1453_v15, %v420_v16 }
 0x650   :  { %424 = vrot.lane.b32.xlu0 %v422_v17, %s1544_s5 }
 0x6c2   :  { %v425_v18 = vpop.permute.xlu0 %424 }
 0x6c3   :  { %v427_v19 = vadd.f32 %v425_v18, %v1691_v42 }
 0x6c5   :  { %1454 = vtanh.f32 %v427_v19 }
 0x6cf   :  { %v1455_v20 = vpop.eup %1454 }
 0x6d0   :  { %v430_v21 = vrot.slane %v1455_v20, 1 }
 0x6d2   :  { %v432_v22 = vsub.f32 %v330_v3, %v430_v21 }
 0x6d4   :  { %v434_v23 = vrot.slane %v432_v22, 7 }
 0x6d6   :  { %435 = vrot.lane.b32.xlu1 %v434_v23, %s1547_s13 }
 0x748   :  { %v436_v24 = vpop.permute.xlu1 %435 }
 0x749   :  { %v438_v25 = vmul.f32 %v1453_v15, %v436_v24 }
 0x74b   :  { %440 = vrot.lane.b32.xlu0 %v438_v25, %s1546_s4 }
 0x7bd   :  { %v441_v26 = vpop.permute.xlu0 %440 }
 0x7be   :  { %v1714_v27 = vadd.f32 %v1455_v20, %v441_v26 }
 0x7c0   :  { %v450_v29 = vrot.slane %v1714_v27, 1 }
 0x7c2   :  { %451 = vrot.lane.b32.xlu1 %v450_v29, %s1544_s5 }
 0x834   :  { %v452_v30 = vpop.permute.xlu1 %451 }
 0x835   :  { %1310 = vmatmul.mubr.msk.f32.vlgmr.msra.gmra.mrb[4].mxu1 %vm127_vm3, %v452_v30 }
 0x836   :  { %1411 = vmatpush3.bf16.msra.mxu1 %v1650_v28  ;;  %1331 = vmatprep.mubr.msk.f32.mxu1 %vm1542_vm0, %v1543_v11 }
 0x837   :  { %1412 = vmatprep.subr.bf16.mxu1 %v1541_v4 }
 0x83a   :  { %1414 = vmatpush3.bf16.msra.mxu1 %v1660_v31 }
 0x83b   :  { %1421 = vmatprep.subr.bf16.mxu1 %v1541_v4 }
 0x908   :  { %v521_v32 = vpop.f32.mrb[4].mxu1 }
 0x909   :  { %v522_v33 = vadd.f32 %v521_v32, %v1684_v37  ;;  %v1311_v34 = vpop.f32.mrb[5].mxu1 }
 0x90b   :  { %v526_v35 = vrot.slane %v522_v33, 6 }
 0x90d   :  { %535 = vrot.lane.b32.xlu0 %v526_v35, %s1544_s5  ;;  %v528_v36 = vadd.f32 %v526_v35, %v1691_v42 }
 0x90f   :  { %v1184_v38 = vmul.f32 -1.442695, %v528_v36 }
 0x911   :  { %1456 = vpow2.f32 %v1184_v38 }
 0x91b   :  { %v1457_v39 = vpop.eup %1456 }
 0x91c   :  { %v532_v40 = vadd.f32 1.0, %v1457_v39 }
 0x91e   :  { %1458 = vrcp.f32 %v532_v40 }
 0x928   :  { %v1459_v41 = vpop.eup %1458 }
 0x97f   :  { %v536_v43 = vpop.permute.xlu0 %535 }
 0x980   :  { %v538_v44 = vmul.f32 %v1459_v41, %v536_v43 }
 0x982   :  { %540 = vrot.lane.b32.xlu1 %v538_v44, %s1544_s5 }
 0x9f4   :  { %v541_v45 = vpop.permute.xlu1 %540 }
 0x9f5   :  { %v543_v46 = vadd.f32 %v541_v45, %v1691_v42 }
 0x9f7   :  { %1460 = vtanh.f32 %v543_v46 }
 0xa01   :  { %v1461_v47 = vpop.eup %1460 }
 0xa02   :  { %v546_v48 = vrot.slane %v1461_v47, 1 }
 0xa04   :  { %v548_v49 = vsub.f32 %v1714_v27, %v546_v48 }
 0xa06   :  { %v550_v50 = vrot.slane %v548_v49, 7 }
 0xa08   :  { %551 = vrot.lane.b32.xlu0 %v550_v50, %s1547_s13 }
 0xa7a   :  { %v552_v51 = vpop.permute.xlu0 %551 }
 0xa7b   :  { %v554_v52 = vmul.f32 %v1459_v41, %v552_v51 }
 0xa7d   :  { %556 = vrot.lane.b32.xlu1 %v554_v52, %s1546_s4 }
 0xaef   :  { %v557_v53 = vpop.permute.xlu1 %556 }
 0xaf0   :  { %v1733_v54 = vadd.f32 %v1461_v47, %v557_v53 }
 0xaf2   :  { %v566_v55 = vrot.slane %v1733_v54, 2 }
 0xaf4   :  { %567 = vrot.lane.b32.xlu0 %v566_v55, %s1544_s5 }
 0xb66   :  { %v568_v56 = vpop.permute.xlu0 %567 }
 0xb67   :  { %1321 = vmatmul.mubr.msk.f32.vlgmr.msra.gmra.mrb[4].mxu0 %vm127_vm3, %v568_v56 }
 0xb68   :  { %1417 = vmatpush3.bf16.msra.mxu0 %v1650_v28  ;;  %1342 = vmatprep.mubr.msk.f32.mxu0 %vm1542_vm0, %v1543_v11 }
 0xb69   :  { %1418 = vmatprep.subr.bf16.mxu0 %v1541_v4 }
 0xb6c   :  { %1420 = vmatpush3.bf16.msra.mxu0 %v1660_v31 }
 0xb6d   :  { %1427 = vmatprep.subr.bf16.mxu0 %v1541_v4 }
 0xc3a   :  { %v637_v57 = vpop.f32.mrb[4].mxu0 }
 0xc3b   :  { %v638_v58 = vadd.f32 %v637_v57, %v1684_v37  ;;  %v1322_v59 = vpop.f32.mrb[5].mxu0 }
 0xc3d   :  { %v642_v60 = vrot.slane %v638_v58, 5 }
 0xc3f   :  { %651 = vrot.lane.b32.xlu1 %v642_v60, %s1544_s5  ;;  %v644_v61 = vadd.f32 %v642_v60, %v1691_v42 }
 0xc41   :  { %v1186_v62 = vmul.f32 -1.442695, %v644_v61 }
 0xc43   :  { %1462 = vpow2.f32 %v1186_v62 }
 0xc4d   :  { %v1463_v63 = vpop.eup %1462 }
 0xc4e   :  { %v648_v0 = vadd.f32 1.0, %v1463_v63 }
 0xc50   :  { %1464 = vrcp.f32 %v648_v0 }
 0xc5a   :  { %v1465_v1 = vpop.eup %1464 }
 0xcb1   :  { %v652_v2 = vpop.permute.xlu1 %651 }
 0xcb2   :  { %v654_v3 = vmul.f32 %v1465_v1, %v652_v2 }
 0xcb4   :  { %656 = vrot.lane.b32.xlu0 %v654_v3, %s1544_s5 }
 0xd26   :  { %v657_v5 = vpop.permute.xlu0 %656 }
 0xd27   :  { %v659_v6 = vadd.f32 %v657_v5, %v1691_v42 }
 0xd29   :  { %1466 = vtanh.f32 %v659_v6 }
 0xd33   :  { %v1467_v7 = vpop.eup %1466 }
 0xd34   :  { %v662_v8 = vrot.slane %v1467_v7, 1 }
 0xd36   :  { %v664_v9 = vsub.f32 %v1733_v54, %v662_v8 }
 0xd38   :  { %v666_v10 = vrot.slane %v664_v9, 7 }
 0xd3a   :  { %667 = vrot.lane.b32.xlu1 %v666_v10, %s1547_s13 }
 0xdac   :  { %v668_v12 = vpop.permute.xlu1 %667 }
 0xdad   :  { %v670_v13 = vmul.f32 %v1465_v1, %v668_v12 }
 0xdaf   :  { %672 = vrot.lane.b32.xlu0 %v670_v13, %s1546_s4 }
 0xe21   :  { %v673_v14 = vpop.permute.xlu0 %672 }
 0xe22   :  { %v1752_v15 = vadd.f32 %v1467_v7, %v673_v14 }
 0xe24   :  { %v682_v16 = vrot.slane %v1752_v15, 3 }
 0xe26   :  { %683 = vrot.lane.b32.xlu1 %v682_v16, %s1544_s5 }
 0xe98   :  { %v684_v17 = vpop.permute.xlu1 %683 }
 0xe99   :  { %1332 = vmatmul.mubr.msk.f32.vlgmr.msra.gmra.mrb[6].mxu1 %vm127_vm3, %v684_v17 }
 0xe9a   :  { %1423 = vmatpush3.bf16.msra.mxu1 %v1650_v28  ;;  %1353 = vmatprep.mubr.msk.f32.mxu1 %vm1542_vm0, %v1543_v11 }
 0xe9b   :  { %1424 = vmatprep.subr.bf16.mxu1 %v1541_v4 }
 0xe9e   :  { %1426 = vmatpush3.bf16.msra.mxu1 %v1660_v31 }
 0xf6c   :  { %v753_v18 = vpop.f32.mrb[6].mxu1 }
 0xf6d   :  { %v754_v19 = vadd.f32 %v753_v18, %v1684_v37  ;;  %v1333_v20 = vpop.f32.mrb[7].mxu1 }
 0xf6f   :  { %v758_v21 = vrot.slane %v754_v19, 4 }
 0xf71   :  { %767 = vrot.lane.b32.xlu0 %v758_v21, %s1544_s5  ;;  %v760_v22 = vadd.f32 %v758_v21, %v1691_v42 }
 0xf73   :  { %v1188_v23 = vmul.f32 -1.442695, %v760_v22 }
 0xf75   :  { %1468 = vpow2.f32 %v1188_v23 }
 0xf7f   :  { %v1469_v24 = vpop.eup %1468 }
 0xf80   :  { %v764_v25 = vadd.f32 1.0, %v1469_v24 }
 0xf82   :  { %1470 = vrcp.f32 %v764_v25 }
 0xf8c   :  { %v1471_v26 = vpop.eup %1470 }
 0xfe3   :  { %v768_v29 = vpop.permute.xlu0 %767 }
 0xfe4   :  { %v770_v30 = vmul.f32 %v1471_v26, %v768_v29 }
 0xfe6   :  { %772 = vrot.lane.b32.xlu1 %v770_v30, %s1544_s5 }
0x1058   :  { %v773_v32 = vpop.permute.xlu1 %772 }
0x1059   :  { %v775_v33 = vadd.f32 %v773_v32, %v1691_v42 }
0x105b   :  { %1472 = vtanh.f32 %v775_v33 }
0x1065   :  { %v1473_v34 = vpop.eup %1472 }
0x1066   :  { %v778_v35 = vrot.slane %v1473_v34, 1 }
0x1068   :  { %v780_v36 = vsub.f32 %v1752_v15, %v778_v35 }
0x106a   :  { %v782_v38 = vrot.slane %v780_v36, 7 }
0x106c   :  { %783 = vrot.lane.b32.xlu0 %v782_v38, %s1547_s13 }
0x10de   :  { %v784_v39 = vpop.permute.xlu0 %783 }
0x10df   :  { %v786_v40 = vmul.f32 %v1471_v26, %v784_v39 }
0x10e1   :  { %788 = vrot.lane.b32.xlu1 %v786_v40, %s1546_s4 }
0x1153   :  { %v789_v41 = vpop.permute.xlu1 %788 }
0x1154   :  { %v1770_v43 = vadd.f32 %v1473_v34, %v789_v41 }
0x1156   :  { %v798_v44 = vrot.slane %v1770_v43, 4 }
0x1158   :  { %799 = vrot.lane.b32.xlu0 %v798_v44, %s1544_s5 }
0x11ca   :  { %v800_v45 = vpop.permute.xlu0 %799 }
0x11cb   :  { %1343 = vmatmul.mubr.msk.f32.vlgmr.msra.gmra.mrb[6].mxu0 %vm127_vm3, %v800_v45 }
0x11cc   :  { %1429 = vmatpush3.bf16.msra.mxu0 %v1650_v28  ;;  %1364 = vmatprep.mubr.msk.f32.mxu0 %vm1542_vm0, %v1543_v11 }
0x11cd   :  { %1430 = vmatprep.subr.bf16.mxu0 %v1541_v4 }
0x11d0   :  { %1432 = vmatpush3.bf16.msra.mxu0 %v1660_v31 }
0x129e   :  { %v869_v46 = vpop.f32.mrb[6].mxu0 }
0x129f   :  { %v870_v47 = vadd.f32 %v869_v46, %v1684_v37  ;;  %v1344_v48 = vpop.f32.mrb[7].mxu0 }
0x12a1   :  { %v874_v49 = vrot.slane %v870_v47, 3 }
0x12a3   :  { %883 = vrot.lane.b32.xlu1 %v874_v49, %s1544_s5  ;;  %v876_v50 = vadd.f32 %v874_v49, %v1691_v42 }
0x12a5   :  { %v1190_v51 = vmul.f32 -1.442695, %v876_v50 }
0x12a7   :  { %1474 = vpow2.f32 %v1190_v51 }
0x12b1   :  { %v1475_v52 = vpop.eup %1474 }
0x12b2   :  { %v880_v28 = vadd.f32 1.0, %v1475_v52 }
0x12b4   :  { %1476 = vrcp.f32 %v880_v28 }
0x12be   :  { %v1477_v53 = vpop.eup %1476 }
0x1315   :  { %v884_v11 = vpop.permute.xlu1 %883 }
0x1316   :  { %v886_v55 = vmul.f32 %v1477_v53, %v884_v11 }
0x1318   :  { %888 = vrot.lane.b32.xlu0 %v886_v55, %s1544_s5 }
0x138a   :  { %v889_v4 = vpop.permute.xlu0 %888 }
0x138b   :  { %v891_v31 = vadd.f32 %v889_v4, %v1691_v42 }
0x138d   :  { %1478 = vtanh.f32 %v891_v31 }
0x1397   :  { %v1479_v56 = vpop.eup %1478 }
0x1398   :  { %v894_v57 = vrot.slane %v1479_v56, 1 }
0x139a   :  { %v896_v58 = vsub.f32 %v1770_v43, %v894_v57 }
0x139c   :  { %v898_v59 = vrot.slane %v896_v58, 7 }
0x139e   :  { %899 = vrot.lane.b32.xlu1 %v898_v59, %s1547_s13 }
0x1410   :  { %v900_v60 = vpop.permute.xlu1 %899 }
0x1411   :  { %v902_v61 = vmul.f32 %v1477_v53, %v900_v60 }
0x1413   :  { %904 = vrot.lane.b32.xlu0 %v902_v61, %s1546_s4 }
0x1485   :  { %v905_v62 = vpop.permute.xlu0 %904 }
0x1486   :  { %v907_v63 = vadd.f32 %v1479_v56, %v905_v62 }
0x1488   :  { %v914_v0 = vrot.slane %v907_v63, 5 }
0x148a   :  { %915 = vrot.lane.b32.xlu1 %v914_v0, %s1544_s5 }
0x14fc   :  { %v916_v1 = vpop.permute.xlu1 %915 }
0x14fd   :  { %1354 = vmatmul.mubr.msk.f32.vlgmr.msra.gmra.mrb[8].mxu1 %vm127_vm3, %v916_v1 }
0x15d0   :  { %v985_v2 = vpop.f32.mrb[8].mxu1 }
0x15d1   :  { %v986_v3 = vadd.f32 %v985_v2, %v1684_v37  ;;  %v1355_v5 = vpop.f32.mrb[9].mxu1 }
0x15d3   :  { %v990_v6 = vrot.slane %v986_v3, 2 }
0x15d5   :  { %999 = vrot.lane.b32.xlu0 %v990_v6, %s1544_s5  ;;  %v992_v7 = vadd.f32 %v990_v6, %v1691_v42 }
0x15d7   :  { %v1192_v8 = vmul.f32 -1.442695, %v992_v7 }
0x15d9   :  { %1480 = vpow2.f32 %v1192_v8 }
0x15e3   :  { %v1481_v9 = vpop.eup %1480 }
0x15e4   :  { %v996_v10 = vadd.f32 1.0, %v1481_v9 }
0x15e6   :  { %1482 = vrcp.f32 %v996_v10 }
0x15f0   :  { %v1483_v12 = vpop.eup %1482 }
0x1647   :  { %v1000_v13 = vpop.permute.xlu0 %999 }
0x1648   :  { %v1002_v14 = vmul.f32 %v1483_v12, %v1000_v13 }
0x164a   :  { %1004 = vrot.lane.b32.xlu1 %v1002_v14, %s1544_s5 }
0x16bc   :  { %v1005_v16 = vpop.permute.xlu1 %1004 }
0x16bd   :  { %v1007_v17 = vadd.f32 %v1005_v16, %v1691_v42 }
0x16bf   :  { %1484 = vtanh.f32 %v1007_v17 }
0x16c9   :  { %v1485_v18 = vpop.eup %1484 }
0x16ca   :  { %v1010_v19 = vrot.slane %v1485_v18, 1 }
0x16cc   :  { %v1012_v20 = vsub.f32 %v907_v63, %v1010_v19 }
0x16ce   :  { %v1014_v21 = vrot.slane %v1012_v20, 7 }
0x16d0   :  { %1015 = vrot.lane.b32.xlu0 %v1014_v21, %s1547_s13 }
0x1742   :  { %v1016_v22 = vpop.permute.xlu0 %1015 }
0x1743   :  { %v1018_v23 = vmul.f32 %v1483_v12, %v1016_v22 }
0x1745   :  { %1020 = vrot.lane.b32.xlu1 %v1018_v23, %s1546_s4 }
0x17b7   :  { %v1021_v24 = vpop.permute.xlu1 %1020 }
0x17b8   :  { %v1023_v25 = vadd.f32 %v1485_v18, %v1021_v24 }
0x17ba   :  { %v1030_v26 = vrot.slane %v1023_v25, 6 }
0x17bc   :  { %1031 = vrot.lane.b32.xlu0 %v1030_v26, %s1544_s5 }
0x182e   :  { %v1032_v29 = vpop.permute.xlu0 %1031 }
0x182f   :  { %1365 = vmatmul.mubr.msk.f32.vlgmr.msra.gmra.mrb[8].mxu0 %vm127_vm3, %v1032_v29 }
0x1902   :  { %v1101_v30 = vpop.f32.mrb[8].mxu0 }
0x1903   :  { %v1102_v32 = vadd.f32 %v1101_v30, %v1684_v37  ;;  %v1366_v33 = vpop.f32.mrb[9].mxu0 }
0x1905   :  { %v1106_v34 = vrot.slane %v1102_v32, 1 }
0x1907   :  { %1115 = vrot.lane.b32.xlu1 %v1106_v34, %s1544_s5  ;;  %v1108_v35 = vadd.f32 %v1106_v34, %v1691_v42 }
0x1909   :  { %v1194_v36 = vmul.f32 -1.442695, %v1108_v35 }
0x190b   :  { %1486 = vpow2.f32 %v1194_v36 }
0x1915   :  { %v1487_v38 = vpop.eup %1486 }
0x1916   :  { %v1112_v39 = vadd.f32 1.0, %v1487_v38 }
0x1918   :  { %1488 = vrcp.f32 %v1112_v39 }
0x1922   :  { %v1489_v40 = vpop.eup %1488 }
0x1979   :  { %v1116_v41 = vpop.permute.xlu1 %1115 }
0x197a   :  { %v1118_v44 = vmul.f32 %v1489_v40, %v1116_v41 }
0x197c   :  { %1120 = vrot.lane.b32.xlu0 %v1118_v44, %s1544_s5 }
0x19ee   :  { %v1121_v45 = vpop.permute.xlu0 %1120 }
0x19ef   :  { %v1123_v46 = vadd.f32 %v1121_v45, %v1691_v42 }
0x19f1   :  { %1490 = vtanh.f32 %v1123_v46 }
0x19fb   :  { %v1491_v37 = vpop.eup %1490 }
0x19fc   :  { %v1126_v47 = vrot.slane %v1491_v37, 1 }
0x19fe   :  { %v1128_v48 = vsub.f32 %v1023_v25, %v1126_v47 }
0x1a00   :  { %v1130_v49 = vrot.slane %v1128_v48, 7 }
0x1a02   :  { %1131 = vrot.lane.b32.xlu1 %v1130_v49, %s1547_s13 }
0x1a06   :  { %445 = vrot.lane.b32.xlu1 %v1714_v27, %s1544_s5 }
0x1a0a   :  { %677 = vrot.lane.b32.xlu1 %v1752_v15, %s1544_s5 }
0x1a0e   :  { %909 = vrot.lane.b32.xlu1 %v907_v63, %s1544_s5 }
0x1a74   :  { %v1132_v50 = vpop.permute.xlu1 %1131 }
0x1a75   :  { %v1134_v51 = vmul.f32 %v1489_v40, %v1132_v50 }
0x1a77   :  { %1136 = vrot.lane.b32.xlu0 %v1134_v51, %s1546_s4 }
0x1a78   :  { %v446_v42 = vpop.permute.xlu1 %445 }
0x1a79   :  { %449 = vst.msk [vmem:[#allocation2] sm:$0x2] %vm448_vm5, %v446_v42 }
0x1a7b   :  { %561 = vrot.lane.b32.xlu0 %v1733_v54, %s1544_s5 }
0x1a7c   :  { %v678_v52 = vpop.permute.xlu1 %677 }
0x1a7d   :  { %681 = vst.msk [vmem:[#allocation2] sm:$0x8] %vm680_vm6, %v678_v52 }
0x1a7f   :  { %793 = vrot.lane.b32.xlu0 %v1770_v43, %s1544_s5 }
0x1a80   :  { %v910_v27 = vpop.permute.xlu1 %909 }
0x1a81   :  { %913 = vst.msk [vmem:[#allocation2] sm:$0x20] %vm912_vm7, %v910_v27 }
0x1a83   :  { %1025 = vrot.lane.b32.xlu0 %v1023_v25, %s1544_s5 }
0x1ae9   :  { %v1137_v15 = vpop.permute.xlu0 %1136 }
0x1aea   :  { %v1139_v28 = vadd.f32 %v1491_v37, %v1137_v15 }
0x1aec   :  { %1141 = vrot.lane.b32.xlu1 %v1139_v28, %s1544_s5 }
0x1aed   :  { %v562_v53 = vpop.permute.xlu0 %561 }
0x1aee   :  { %565 = vst.msk [vmem:[#allocation2] sm:$0x4] %vm564_vm8, %v562_v53 }
0x1af1   :  { %v794_v11 = vpop.permute.xlu0 %793 }
0x1af2   :  { %797 = vst.msk [vmem:[#allocation2] sm:$0x10] %vm796_vm9, %v794_v11 }
0x1af5   :  { %v1026_v54 = vpop.permute.xlu0 %1025 }
0x1af6   :  { %1029 = vst.msk [vmem:[#allocation2] sm:$0x40] %vm1028_vm10, %v1026_v54 }
0x1b5e   :  { %v1142_v43 = vpop.permute.xlu1 %1141 }
0x1b5f   :  { %1145 = vst.msk [vmem:[#allocation2] sm:$0x80] %vm1144_vm11, %v1142_v43  ;;  %1146 = vst.msk [vmem:[#allocation4 - $0x7] sm:$0x80] %vm1144_vm11, %v1142_v43 }
0x1b60   :  { %1503 = shalt.err (!%p1500_p4)
}
0x1b61   :  { %s1504_s21 = scalar_lea.hbm %s1855_s6, 128 }
0x1b62   :  { %p1505_p5 = scmp.ne.s32.totalorder %s1855_s6, %s1504_s21  ;;  %p1508_p6 = scmp.lt.u32.totalorder %s1504_s21, %s1855_s6 }
0x1b64   :  { %p1510_p7 = pnand %p1508_p6, %p1505_p5 }
0x1b66   :  { %1513 = shalt.err (!%p1510_p7)
}
0x1b67   :  { %1156 = dma.vmem_to_hbm [thread:$0]  %s1154_s15, 128, %s1855_s6, [#allocation3]  }
0x1b68   :  { %s1514_s26 = scalar_lea.vmem %s1817_s17, 16  ;;  %s1518_s27 = scalar_lea.vmem %s1817_s17, 32 }
0x1b69   :  { %p1515_p8 = scmp.ne.s32.totalorder %s1817_s17, %s1514_s26  ;;  %p1519_p9 = scmp.lt.s32.totalorder %s1817_s17, %s1817_s17 }
0x1b6a   :  { %p1520_p10 = scmp.lt.s32.totalorder %s1518_s27, %s1514_s26 }
0x1b6c   :  { %p1521_p11 = por %p1520_p10, %p1519_p9 }
0x1b6e   :  { %p1522_p12 = pnand %p1521_p11, %p1515_p8 }
0x1b70   :  { %1525 = shalt.err (!%p1522_p12)
}
0x1b71   :  { %s1526_s30 = scalar_lea.hbm %s1856_s7, 16 }
0x1b72   :  { %p1527_p13 = scmp.ne.s32.totalorder %s1856_s7, %s1526_s30  ;;  %p1530_p0 = scmp.lt.u32.totalorder %s1526_s30, %s1856_s7 }
0x1b74   :  { %p1532_p1 = pnand %p1530_p0, %p1527_p13 }
0x1b76   :  { %1535 = shalt.err (!%p1532_p1)
}
0x1b77   :  { %1166 = dma.vmem_to_hbm [thread:$0]  %s1817_s17, 16, %s1856_s7, [#allocation5]  }
0x1b78   :  { %1536 = dma.done.wait [#allocation3], 128  }
0x1b79   :  { %1537 = vsyncadd [#allocation3], 4294967168 }
0x1b7a   :  { %1538 = dma.done.wait [#allocation5], 16  }
0x1b7b   :  { %1539 = vsyncadd [#allocation5], 4294967280 }
0x1b7c   :  { %1173 = vsyncpa [#allocation3], 1 }
0x1b7d   :  { %1174 = vsyncpa [#allocation5], 1 }

</bundles_post_ra>
